<compile_context>
chip_gen: v7x
topology: tpu7x:2x2x1
jax: 0.10.0
libtpu: 0.0.40
codegen_flags: <defaults>
</compile_context>

<pallas_src>
import functools

import jax
import jax.numpy as jnp
from jax import lax
from jax.experimental import pallas as pl
from jax.experimental.pallas import tpu as pltpu

# Small config consistent with the module (emb_dim % n_heads == 0)
BATCH = 2
SEQ = 8          # num_tokens == context_length for this test
EMB = 32         # emb_dim
N_HEADS = 4
HEAD_DIM = EMB // N_HEADS


def mha_kernel(x_ref, wqkv_ref, wo_ref, bo_ref, o_ref, *, batch, seq, emb, n_heads):
    head_dim = emb // n_heads

    x = x_ref[...]                                           # (B*T, D)

    # Fused Q/K/V projection: one MXU push/drain with N = 3*D instead of three.
    qkv = jnp.dot(x, wqkv_ref[...], preferred_element_type=jnp.float32)  # (B*T, 3D)

    # Apply 1/sqrt(head_dim) once to q (instead of per-head on every (T,T) score).
    scale = 1.0 / jnp.sqrt(jnp.float32(head_dim))
    q = qkv[:, 0:emb] * scale
    k = qkv[:, emb:2 * emb]
    v = qkv[:, 2 * emb:3 * emb]

    # Causal mask: positions with col > row are masked.  Use a large finite
    # negative (robust; no -inf arithmetic / NaN hazard).
    row = lax.broadcasted_iota(jnp.int32, (seq, seq), 0)
    col = lax.broadcasted_iota(jnp.int32, (seq, seq), 1)
    causal = col > row
    neg_big = jnp.float32(-1e30)

    # Attention stays per (batch, head) on in-register data; B*H = 8 static iters.
    batch_ctx = []
    for b in range(batch):
        qb = q[b * seq:(b + 1) * seq]
        kb = k[b * seq:(b + 1) * seq]
        vb = v[b * seq:(b + 1) * seq]
        head_ctx = []
        for h in range(n_heads):
            lo = h * head_dim
            hi = lo + head_dim
            qh = qb[:, lo:hi]                                # (T, hd)
            kh = kb[:, lo:hi]
            vh = vb[:, lo:hi]

            # Contract on the last dim of both operands -> straight to the MXU,
            # no explicit kh.T (XLU transpose) needed.
            s = lax.dot_general(qh, kh, (((1,), (1,)), ((), ())),
                                preferred_element_type=jnp.float32)   # (T, T)
            s = jnp.where(causal, neg_big, s)

            # Softmax with deferred normalization: normalize the small (T, hd)
            # context instead of dividing the (T, T) weight matrix.
            m = jnp.max(s, axis=-1, keepdims=True)
            e = jnp.exp(s - m)
            l = jnp.sum(e, axis=-1, keepdims=True)
            # TODO(synk): nn.Dropout(drop_rate) on attn weights — identity
            # (eval-mode semantics).
            ctx_h = jnp.dot(e, vh, preferred_element_type=jnp.float32)  # (T, hd)
            head_ctx.append(ctx_h * (1.0 / l))

        batch_ctx.append(jnp.concatenate(head_ctx, axis=-1))            # (T, D)

    # Keep the context entirely in vregs (no VMEM scratch round trip).
    ctx = jnp.concatenate(batch_ctx, axis=0)                            # (B*T, D)

    # Output projection (with bias).
    out = jnp.dot(ctx, wo_ref[...], preferred_element_type=jnp.float32)
    out = out + bo_ref[0]                                    # broadcast (D,) over rows
    o_ref[...] = out.astype(o_ref.dtype)


def multi_head_attention(x, wq_t, wk_t, wv_t, wo_t, bo):
    B, T, D = x.shape
    BT = B * T

    # Flatten batch*seq so the whole problem is one grid step (kills per-step
    # overhead and doubles sublane occupancy of the projection matmuls).
    x2 = x.reshape(BT, D)
    wqkv = jnp.concatenate([wq_t, wk_t, wv_t], axis=1)       # (D, 3D)
    bo2d = bo.reshape(1, D)

    kernel = functools.partial(mha_kernel, batch=B, seq=T, emb=D, n_heads=N_HEADS)

    out2 = pl.pallas_call(
        kernel,
        out_shape=jax.ShapeDtypeStruct((BT, D), x.dtype),
        grid_spec=pltpu.PrefetchScalarGridSpec(
            num_scalar_prefetch=0,
            grid=(1,),                                       # single invocation
            in_specs=[
                pl.BlockSpec((BT, D), lambda i: (0, 0)),     # x (flattened)
                pl.BlockSpec((D, 3 * D), lambda i: (0, 0)),  # fused [Wq^T | Wk^T | Wv^T]
                pl.BlockSpec((D, D), lambda i: (0, 0)),      # Wo^T
                pl.BlockSpec((1, D), lambda i: (0, 0)),      # out_proj bias
            ],
            out_specs=pl.BlockSpec((BT, D), lambda i: (0, 0)),
        ),
        compiler_params=pltpu.CompilerParams(
            dimension_semantics=("arbitrary",)),
    )(x2, wqkv, wo_t, bo2d)
    return out2.reshape(B, T, D)


def reference(x, wq_t, wk_t, wv_t, wo_t, bo):
    B, T, D = x.shape
    q = x @ wq_t
    k = x @ wk_t
    v = x @ wv_t
    q = q.reshape(B, T, N_HEADS, HEAD_DIM).transpose(0, 2, 1, 3)
    k = k.reshape(B, T, N_HEADS, HEAD_DIM).transpose(0, 2, 1, 3)
    v = v.reshape(B, T, N_HEADS, HEAD_DIM).transpose(0, 2, 1, 3)
    s = jnp.einsum("bhqd,bhkd->bhqk", q, k)
    mask = jnp.triu(jnp.ones((T, T), dtype=bool), k=1)
    s = jnp.where(mask[None, None], -jnp.inf, s)
    p = jax.nn.softmax(s / jnp.sqrt(jnp.float32(HEAD_DIM)), axis=-1)
    ctx = jnp.einsum("bhqk,bhkd->bhqd", p, v).transpose(0, 2, 1, 3).reshape(B, T, D)
    return ctx @ wo_t + bo


if __name__ == "__main__":
    key = jax.random.PRNGKey(0)
    kx, kq, kk, kv, ko, kb = jax.random.split(key, 6)

    x = jax.random.normal(kx, (BATCH, SEQ, EMB), dtype=jnp.float32)

    # PyTorch nn.Linear weight shape is (out, in); build then transpose for x @ W.T
    scale = 1.0 / jnp.sqrt(jnp.float32(EMB))
    Wq = jax.random.normal(kq, (EMB, EMB), dtype=jnp.float32) * scale
    Wk = jax.random.normal(kk, (EMB, EMB), dtype=jnp.float32) * scale
    Wv = jax.random.normal(kv, (EMB, EMB), dtype=jnp.float32) * scale
    Wo = jax.random.normal(ko, (EMB, EMB), dtype=jnp.float32) * scale
    bo = jax.random.normal(kb, (EMB,), dtype=jnp.float32) * 0.01

    wq_t, wk_t, wv_t, wo_t = Wq.T, Wk.T, Wv.T, Wo.T

    out = multi_head_attention(x, wq_t, wk_t, wv_t, wo_t, bo)
    out = jax.block_until_ready(out)

    ref = reference(x, wq_t, wk_t, wv_t, wo_t, bo)
    assert out.shape == (BATCH, SEQ, EMB)
    assert jnp.allclose(out, ref, atol=1e-4, rtol=1e-4), "mismatch vs reference"

    print("KERNEL_OK")
</pallas_src>

<mosaic_0001>
module attributes {stable_mosaic.version = 11 : i64} {
  func.func @mha_kernel(%arg0: i32, %arg1: memref<16x32xf32, #tpu.memory_space<vmem>>, %arg2: memref<32x96xf32, #tpu.memory_space<vmem>>, %arg3: memref<32x32xf32, #tpu.memory_space<vmem>>, %arg4: memref<1x32xf32, #tpu.memory_space<vmem>>, %arg5: memref<16x32xf32, #tpu.memory_space<vmem>>) attributes {dimension_semantics = [#tpu.dimension_semantics<arbitrary>], iteration_bounds = array<i64: 1>, scalar_prefetch = 0 : i64, scratch_operands = 0 : i64, tpu.core_type = #tpu.core_type<tc>, window_params = [{pipeline_mode = #tpu.pipeline_mode<synchronous>, transform_indices = @transform_0, window_bounds = array<i64: 16, 32>}, {pipeline_mode = #tpu.pipeline_mode<synchronous>, transform_indices = @transform_1, window_bounds = array<i64: 32, 96>}, {pipeline_mode = #tpu.pipeline_mode<synchronous>, transform_indices = @transform_2, window_bounds = array<i64: 32, 32>}, {pipeline_mode = #tpu.pipeline_mode<synchronous>, transform_indices = @transform_3, window_bounds = array<i64: 1, 32>}, {pipeline_mode = #tpu.pipeline_mode<synchronous>, transform_indices = @transform_4, window_bounds = array<i64: 16, 32>}]} {
    %c0 = arith.constant 0 : index
    %c0_0 = arith.constant 0 : index
    %0 = vector.load %arg1[%c0, %c0_0] : memref<16x32xf32, #tpu.memory_space<vmem>>, vector<16x32xf32>
    %c0_1 = arith.constant 0 : index
    %c0_2 = arith.constant 0 : index
    %1 = vector.load %arg2[%c0_1, %c0_2] : memref<32x96xf32, #tpu.memory_space<vmem>>, vector<32x96xf32>
    %cst = arith.constant dense<0.000000e+00> : vector<16x96xf32>
    %2 = tpu.matmul %0, %1, %cst {dimension_numbers = #tpu.dot_dimension_numbers<[1], [0], [0], [1], [0, 0, 1, 1], [], []>} : vector<16x32xf32>, vector<32x96xf32>, vector<16x96xf32> -> vector<16x96xf32>
    %cst_3 = arith.constant 8.000000e+00 : f32
    %3 = math.sqrt %cst_3 : f32
    %cst_4 = arith.constant 1.000000e+00 : f32
    %4 = arith.divf %cst_4, %3 : f32
    %5 = vector.extract_strided_slice %2 {offsets = [0, 0], sizes = [16, 32], strides = [1, 1]} : vector<16x96xf32> to vector<16x32xf32>
    %6 = vector.broadcast %4 : f32 to vector<16x32xf32>
    %7 = arith.mulf %5, %6 : vector<16x32xf32>
    %8 = vector.extract_strided_slice %2 {offsets = [0, 32], sizes = [16, 32], strides = [1, 1]} : vector<16x96xf32> to vector<16x32xf32>
    %9 = vector.extract_strided_slice %2 {offsets = [0, 64], sizes = [16, 32], strides = [1, 1]} : vector<16x96xf32> to vector<16x32xf32>
    %10 = tpu.iota {dimensions = array<i32: 0>} : vector<8x8xi32>
    %11 = tpu.iota {dimensions = array<i32: 1>} : vector<8x8xi32>
    %12 = arith.cmpi sgt, %11, %10 : vector<8x8xi32>
    %13 = vector.extract_strided_slice %7 {offsets = [0, 0], sizes = [8, 32], strides = [1, 1]} : vector<16x32xf32> to vector<8x32xf32>
    %14 = vector.extract_strided_slice %8 {offsets = [0, 0], sizes = [8, 32], strides = [1, 1]} : vector<16x32xf32> to vector<8x32xf32>
    %15 = vector.extract_strided_slice %9 {offsets = [0, 0], sizes = [8, 32], strides = [1, 1]} : vector<16x32xf32> to vector<8x32xf32>
    %16 = vector.extract_strided_slice %13 {offsets = [0, 0], sizes = [8, 8], strides = [1, 1]} : vector<8x32xf32> to vector<8x8xf32>
    %17 = vector.extract_strided_slice %14 {offsets = [0, 0], sizes = [8, 8], strides = [1, 1]} : vector<8x32xf32> to vector<8x8xf32>
    %18 = vector.extract_strided_slice %15 {offsets = [0, 0], sizes = [8, 8], strides = [1, 1]} : vector<8x32xf32> to vector<8x8xf32>
    %cst_5 = arith.constant dense<0.000000e+00> : vector<8x8xf32>
    %19 = tpu.matmul %16, %17, %cst_5 {dimension_numbers = #tpu.dot_dimension_numbers<[1], [1], [0], [0], [0, 0, 1, 0], [], []>} : vector<8x8xf32>, vector<8x8xf32>, vector<8x8xf32> -> vector<8x8xf32>
    %cst_6 = arith.constant -1.000000e+30 : f32
    %20 = vector.broadcast %cst_6 : f32 to vector<8x8xf32>
    %21 = arith.select %12, %20, %19 : vector<8x8xi1>, vector<8x8xf32>
    %cst_7 = arith.constant dense<0xFF800000> : vector<8xf32>
    %22 = vector.multi_reduction <maximumf>, %21, %cst_7 [1] : vector<8x8xf32> to vector<8xf32>
    %23 = vector.shape_cast %22 : vector<8xf32> to vector<8x1xf32>
    %24 = vector.broadcast %23 : vector<8x1xf32> to vector<8x8xf32>
    %25 = arith.subf %21, %24 : vector<8x8xf32>
    %26 = math.exp %25 : vector<8x8xf32>
    %cst_8 = arith.constant dense<0.000000e+00> : vector<8xf32>
    %27 = vector.multi_reduction <add>, %26, %cst_8 [1] : vector<8x8xf32> to vector<8xf32>
    %28 = vector.shape_cast %27 : vector<8xf32> to vector<8x1xf32>
    %cst_9 = arith.constant dense<0.000000e+00> : vector<8x8xf32>
    %29 = tpu.matmul %26, %18, %cst_9 {dimension_numbers = #tpu.dot_dimension_numbers<[1], [0], [0], [1], [0, 0, 1, 1], [], []>} : vector<8x8xf32>, vector<8x8xf32>, vector<8x8xf32> -> vector<8x8xf32>
    %cst_10 = arith.constant 1.000000e+00 : f32
    %30 = vector.broadcast %cst_10 : f32 to vector<8x1xf32>
    %31 = arith.divf %30, %28 : vector<8x1xf32>
    %32 = vector.broadcast %31 : vector<8x1xf32> to vector<8x8xf32>
    %33 = arith.mulf %29, %32 : vector<8x8xf32>
    %34 = vector.extract_strided_slice %13 {offsets = [0, 8], sizes = [8, 8], strides = [1, 1]} : vector<8x32xf32> to vector<8x8xf32>
    %35 = vector.extract_strided_slice %14 {offsets = [0, 8], sizes = [8, 8], strides = [1, 1]} : vector<8x32xf32> to vector<8x8xf32>
    %36 = vector.extract_strided_slice %15 {offsets = [0, 8], sizes = [8, 8], strides = [1, 1]} : vector<8x32xf32> to vector<8x8xf32>
    %cst_11 = arith.constant dense<0.000000e+00> : vector<8x8xf32>
    %37 = tpu.matmul %34, %35, %cst_11 {dimension_numbers = #tpu.dot_dimension_numbers<[1], [1], [0], [0], [0, 0, 1, 0], [], []>} : vector<8x8xf32>, vector<8x8xf32>, vector<8x8xf32> -> vector<8x8xf32>
    %cst_12 = arith.constant -1.000000e+30 : f32
    %38 = vector.broadcast %cst_12 : f32 to vector<8x8xf32>
    %39 = arith.select %12, %38, %37 : vector<8x8xi1>, vector<8x8xf32>
    %cst_13 = arith.constant dense<0xFF800000> : vector<8xf32>
    %40 = vector.multi_reduction <maximumf>, %39, %cst_13 [1] : vector<8x8xf32> to vector<8xf32>
    %41 = vector.shape_cast %40 : vector<8xf32> to vector<8x1xf32>
    %42 = vector.broadcast %41 : vector<8x1xf32> to vector<8x8xf32>
    %43 = arith.subf %39, %42 : vector<8x8xf32>
    %44 = math.exp %43 : vector<8x8xf32>
    %cst_14 = arith.constant dense<0.000000e+00> : vector<8xf32>
    %45 = vector.multi_reduction <add>, %44, %cst_14 [1] : vector<8x8xf32> to vector<8xf32>
    %46 = vector.shape_cast %45 : vector<8xf32> to vector<8x1xf32>
    %cst_15 = arith.constant dense<0.000000e+00> : vector<8x8xf32>
    %47 = tpu.matmul %44, %36, %cst_15 {dimension_numbers = #tpu.dot_dimension_numbers<[1], [0], [0], [1], [0, 0, 1, 1], [], []>} : vector<8x8xf32>, vector<8x8xf32>, vector<8x8xf32> -> vector<8x8xf32>
    %cst_16 = arith.constant 1.000000e+00 : f32
    %48 = vector.broadcast %cst_16 : f32 to vector<8x1xf32>
    %49 = arith.divf %48, %46 : vector<8x1xf32>
    %50 = vector.broadcast %49 : vector<8x1xf32> to vector<8x8xf32>
    %51 = arith.mulf %47, %50 : vector<8x8xf32>
    %52 = vector.extract_strided_slice %13 {offsets = [0, 16], sizes = [8, 8], strides = [1, 1]} : vector<8x32xf32> to vector<8x8xf32>
    %53 = vector.extract_strided_slice %14 {offsets = [0, 16], sizes = [8, 8], strides = [1, 1]} : vector<8x32xf32> to vector<8x8xf32>
    %54 = vector.extract_strided_slice %15 {offsets = [0, 16], sizes = [8, 8], strides = [1, 1]} : vector<8x32xf32> to vector<8x8xf32>
    %cst_17 = arith.constant dense<0.000000e+00> : vector<8x8xf32>
    %55 = tpu.matmul %52, %53, %cst_17 {dimension_numbers = #tpu.dot_dimension_numbers<[1], [1], [0], [0], [0, 0, 1, 0], [], []>} : vector<8x8xf32>, vector<8x8xf32>, vector<8x8xf32> -> vector<8x8xf32>
    %cst_18 = arith.constant -1.000000e+30 : f32
    %56 = vector.broadcast %cst_18 : f32 to vector<8x8xf32>
    %57 = arith.select %12, %56, %55 : vector<8x8xi1>, vector<8x8xf32>
    %cst_19 = arith.constant dense<0xFF800000> : vector<8xf32>
    %58 = vector.multi_reduction <maximumf>, %57, %cst_19 [1] : vector<8x8xf32> to vector<8xf32>
    %59 = vector.shape_cast %58 : vector<8xf32> to vector<8x1xf32>
    %60 = vector.broadcast %59 : vector<8x1xf32> to vector<8x8xf32>
    %61 = arith.subf %57, %60 : vector<8x8xf32>
    %62 = math.exp %61 : vector<8x8xf32>
    %cst_20 = arith.constant dense<0.000000e+00> : vector<8xf32>
    %63 = vector.multi_reduction <add>, %62, %cst_20 [1] : vector<8x8xf32> to vector<8xf32>
    %64 = vector.shape_cast %63 : vector<8xf32> to vector<8x1xf32>
    %cst_21 = arith.constant dense<0.000000e+00> : vector<8x8xf32>
    %65 = tpu.matmul %62, %54, %cst_21 {dimension_numbers = #tpu.dot_dimension_numbers<[1], [0], [0], [1], [0, 0, 1, 1], [], []>} : vector<8x8xf32>, vector<8x8xf32>, vector<8x8xf32> -> vector<8x8xf32>
    %cst_22 = arith.constant 1.000000e+00 : f32
    %66 = vector.broadcast %cst_22 : f32 to vector<8x1xf32>
    %67 = arith.divf %66, %64 : vector<8x1xf32>
    %68 = vector.broadcast %67 : vector<8x1xf32> to vector<8x8xf32>
    %69 = arith.mulf %65, %68 : vector<8x8xf32>
    %70 = vector.extract_strided_slice %13 {offsets = [0, 24], sizes = [8, 8], strides = [1, 1]} : vector<8x32xf32> to vector<8x8xf32>
    %71 = vector.extract_strided_slice %14 {offsets = [0, 24], sizes = [8, 8], strides = [1, 1]} : vector<8x32xf32> to vector<8x8xf32>
    %72 = vector.extract_strided_slice %15 {offsets = [0, 24], sizes = [8, 8], strides = [1, 1]} : vector<8x32xf32> to vector<8x8xf32>
    %cst_23 = arith.constant dense<0.000000e+00> : vector<8x8xf32>
    %73 = tpu.matmul %70, %71, %cst_23 {dimension_numbers = #tpu.dot_dimension_numbers<[1], [1], [0], [0], [0, 0, 1, 0], [], []>} : vector<8x8xf32>, vector<8x8xf32>, vector<8x8xf32> -> vector<8x8xf32>
    %cst_24 = arith.constant -1.000000e+30 : f32
    %74 = vector.broadcast %cst_24 : f32 to vector<8x8xf32>
    %75 = arith.select %12, %74, %73 : vector<8x8xi1>, vector<8x8xf32>
    %cst_25 = arith.constant dense<0xFF800000> : vector<8xf32>
    %76 = vector.multi_reduction <maximumf>, %75, %cst_25 [1] : vector<8x8xf32> to vector<8xf32>
    %77 = vector.shape_cast %76 : vector<8xf32> to vector<8x1xf32>
    %78 = vector.broadcast %77 : vector<8x1xf32> to vector<8x8xf32>
    %79 = arith.subf %75, %78 : vector<8x8xf32>
    %80 = math.exp %79 : vector<8x8xf32>
    %cst_26 = arith.constant dense<0.000000e+00> : vector<8xf32>
    %81 = vector.multi_reduction <add>, %80, %cst_26 [1] : vector<8x8xf32> to vector<8xf32>
    %82 = vector.shape_cast %81 : vector<8xf32> to vector<8x1xf32>
    %cst_27 = arith.constant dense<0.000000e+00> : vector<8x8xf32>
    %83 = tpu.matmul %80, %72, %cst_27 {dimension_numbers = #tpu.dot_dimension_numbers<[1], [0], [0], [1], [0, 0, 1, 1], [], []>} : vector<8x8xf32>, vector<8x8xf32>, vector<8x8xf32> -> vector<8x8xf32>
    %cst_28 = arith.constant 1.000000e+00 : f32
    %84 = vector.broadcast %cst_28 : f32 to vector<8x1xf32>
    %85 = arith.divf %84, %82 : vector<8x1xf32>
    %86 = vector.broadcast %85 : vector<8x1xf32> to vector<8x8xf32>
    %87 = arith.mulf %83, %86 : vector<8x8xf32>
    %88 = tpu.concatenate %33, %51, %69, %87 in 1 : vector<8x8xf32>, vector<8x8xf32>, vector<8x8xf32>, vector<8x8xf32> -> vector<8x32xf32>
    %89 = vector.extract_strided_slice %7 {offsets = [8, 0], sizes = [8, 32], strides = [1, 1]} : vector<16x32xf32> to vector<8x32xf32>
    %90 = vector.extract_strided_slice %8 {offsets = [8, 0], sizes = [8, 32], strides = [1, 1]} : vector<16x32xf32> to vector<8x32xf32>
    %91 = vector.extract_strided_slice %9 {offsets = [8, 0], sizes = [8, 32], strides = [1, 1]} : vector<16x32xf32> to vector<8x32xf32>
    %92 = vector.extract_strided_slice %89 {offsets = [0, 0], sizes = [8, 8], strides = [1, 1]} : vector<8x32xf32> to vector<8x8xf32>
    %93 = vector.extract_strided_slice %90 {offsets = [0, 0], sizes = [8, 8], strides = [1, 1]} : vector<8x32xf32> to vector<8x8xf32>
    %94 = vector.extract_strided_slice %91 {offsets = [0, 0], sizes = [8, 8], strides = [1, 1]} : vector<8x32xf32> to vector<8x8xf32>
    %cst_29 = arith.constant dense<0.000000e+00> : vector<8x8xf32>
    %95 = tpu.matmul %92, %93, %cst_29 {dimension_numbers = #tpu.dot_dimension_numbers<[1], [1], [0], [0], [0, 0, 1, 0], [], []>} : vector<8x8xf32>, vector<8x8xf32>, vector<8x8xf32> -> vector<8x8xf32>
    %cst_30 = arith.constant -1.000000e+30 : f32
    %96 = vector.broadcast %cst_30 : f32 to vector<8x8xf32>
    %97 = arith.select %12, %96, %95 : vector<8x8xi1>, vector<8x8xf32>
    %cst_31 = arith.constant dense<0xFF800000> : vector<8xf32>
    %98 = vector.multi_reduction <maximumf>, %97, %cst_31 [1] : vector<8x8xf32> to vector<8xf32>
    %99 = vector.shape_cast %98 : vector<8xf32> to vector<8x1xf32>
    %100 = vector.broadcast %99 : vector<8x1xf32> to vector<8x8xf32>
    %101 = arith.subf %97, %100 : vector<8x8xf32>
    %102 = math.exp %101 : vector<8x8xf32>
    %cst_32 = arith.constant dense<0.000000e+00> : vector<8xf32>
    %103 = vector.multi_reduction <add>, %102, %cst_32 [1] : vector<8x8xf32> to vector<8xf32>
    %104 = vector.shape_cast %103 : vector<8xf32> to vector<8x1xf32>
    %cst_33 = arith.constant dense<0.000000e+00> : vector<8x8xf32>
    %105 = tpu.matmul %102, %94, %cst_33 {dimension_numbers = #tpu.dot_dimension_numbers<[1], [0], [0], [1], [0, 0, 1, 1], [], []>} : vector<8x8xf32>, vector<8x8xf32>, vector<8x8xf32> -> vector<8x8xf32>
    %cst_34 = arith.constant 1.000000e+00 : f32
    %106 = vector.broadcast %cst_34 : f32 to vector<8x1xf32>
    %107 = arith.divf %106, %104 : vector<8x1xf32>
    %108 = vector.broadcast %107 : vector<8x1xf32> to vector<8x8xf32>
    %109 = arith.mulf %105, %108 : vector<8x8xf32>
    %110 = vector.extract_strided_slice %89 {offsets = [0, 8], sizes = [8, 8], strides = [1, 1]} : vector<8x32xf32> to vector<8x8xf32>
    %111 = vector.extract_strided_slice %90 {offsets = [0, 8], sizes = [8, 8], strides = [1, 1]} : vector<8x32xf32> to vector<8x8xf32>
    %112 = vector.extract_strided_slice %91 {offsets = [0, 8], sizes = [8, 8], strides = [1, 1]} : vector<8x32xf32> to vector<8x8xf32>
    %cst_35 = arith.constant dense<0.000000e+00> : vector<8x8xf32>
    %113 = tpu.matmul %110, %111, %cst_35 {dimension_numbers = #tpu.dot_dimension_numbers<[1], [1], [0], [0], [0, 0, 1, 0], [], []>} : vector<8x8xf32>, vector<8x8xf32>, vector<8x8xf32> -> vector<8x8xf32>
    %cst_36 = arith.constant -1.000000e+30 : f32
    %114 = vector.broadcast %cst_36 : f32 to vector<8x8xf32>
    %115 = arith.select %12, %114, %113 : vector<8x8xi1>, vector<8x8xf32>
    %cst_37 = arith.constant dense<0xFF800000> : vector<8xf32>
    %116 = vector.multi_reduction <maximumf>, %115, %cst_37 [1] : vector<8x8xf32> to vector<8xf32>
    %117 = vector.shape_cast %116 : vector<8xf32> to vector<8x1xf32>
    %118 = vector.broadcast %117 : vector<8x1xf32> to vector<8x8xf32>
    %119 = arith.subf %115, %118 : vector<8x8xf32>
    %120 = math.exp %119 : vector<8x8xf32>
    %cst_38 = arith.constant dense<0.000000e+00> : vector<8xf32>
    %121 = vector.multi_reduction <add>, %120, %cst_38 [1] : vector<8x8xf32> to vector<8xf32>
    %122 = vector.shape_cast %121 : vector<8xf32> to vector<8x1xf32>
    %cst_39 = arith.constant dense<0.000000e+00> : vector<8x8xf32>
    %123 = tpu.matmul %120, %112, %cst_39 {dimension_numbers = #tpu.dot_dimension_numbers<[1], [0], [0], [1], [0, 0, 1, 1], [], []>} : vector<8x8xf32>, vector<8x8xf32>, vector<8x8xf32> -> vector<8x8xf32>
    %cst_40 = arith.constant 1.000000e+00 : f32
    %124 = vector.broadcast %cst_40 : f32 to vector<8x1xf32>
    %125 = arith.divf %124, %122 : vector<8x1xf32>
    %126 = vector.broadcast %125 : vector<8x1xf32> to vector<8x8xf32>
    %127 = arith.mulf %123, %126 : vector<8x8xf32>
    %128 = vector.extract_strided_slice %89 {offsets = [0, 16], sizes = [8, 8], strides = [1, 1]} : vector<8x32xf32> to vector<8x8xf32>
    %129 = vector.extract_strided_slice %90 {offsets = [0, 16], sizes = [8, 8], strides = [1, 1]} : vector<8x32xf32> to vector<8x8xf32>
    %130 = vector.extract_strided_slice %91 {offsets = [0, 16], sizes = [8, 8], strides = [1, 1]} : vector<8x32xf32> to vector<8x8xf32>
    %cst_41 = arith.constant dense<0.000000e+00> : vector<8x8xf32>
    %131 = tpu.matmul %128, %129, %cst_41 {dimension_numbers = #tpu.dot_dimension_numbers<[1], [1], [0], [0], [0, 0, 1, 0], [], []>} : vector<8x8xf32>, vector<8x8xf32>, vector<8x8xf32> -> vector<8x8xf32>
    %cst_42 = arith.constant -1.000000e+30 : f32
    %132 = vector.broadcast %cst_42 : f32 to vector<8x8xf32>
    %133 = arith.select %12, %132, %131 : vector<8x8xi1>, vector<8x8xf32>
    %cst_43 = arith.constant dense<0xFF800000> : vector<8xf32>
    %134 = vector.multi_reduction <maximumf>, %133, %cst_43 [1] : vector<8x8xf32> to vector<8xf32>
    %135 = vector.shape_cast %134 : vector<8xf32> to vector<8x1xf32>
    %136 = vector.broadcast %135 : vector<8x1xf32> to vector<8x8xf32>
    %137 = arith.subf %133, %136 : vector<8x8xf32>
    %138 = math.exp %137 : vector<8x8xf32>
    %cst_44 = arith.constant dense<0.000000e+00> : vector<8xf32>
    %139 = vector.multi_reduction <add>, %138, %cst_44 [1] : vector<8x8xf32> to vector<8xf32>
    %140 = vector.shape_cast %139 : vector<8xf32> to vector<8x1xf32>
    %cst_45 = arith.constant dense<0.000000e+00> : vector<8x8xf32>
    %141 = tpu.matmul %138, %130, %cst_45 {dimension_numbers = #tpu.dot_dimension_numbers<[1], [0], [0], [1], [0, 0, 1, 1], [], []>} : vector<8x8xf32>, vector<8x8xf32>, vector<8x8xf32> -> vector<8x8xf32>
    %cst_46 = arith.constant 1.000000e+00 : f32
    %142 = vector.broadcast %cst_46 : f32 to vector<8x1xf32>
    %143 = arith.divf %142, %140 : vector<8x1xf32>
    %144 = vector.broadcast %143 : vector<8x1xf32> to vector<8x8xf32>
    %145 = arith.mulf %141, %144 : vector<8x8xf32>
    %146 = vector.extract_strided_slice %89 {offsets = [0, 24], sizes = [8, 8], strides = [1, 1]} : vector<8x32xf32> to vector<8x8xf32>
    %147 = vector.extract_strided_slice %90 {offsets = [0, 24], sizes = [8, 8], strides = [1, 1]} : vector<8x32xf32> to vector<8x8xf32>
    %148 = vector.extract_strided_slice %91 {offsets = [0, 24], sizes = [8, 8], strides = [1, 1]} : vector<8x32xf32> to vector<8x8xf32>
    %cst_47 = arith.constant dense<0.000000e+00> : vector<8x8xf32>
    %149 = tpu.matmul %146, %147, %cst_47 {dimension_numbers = #tpu.dot_dimension_numbers<[1], [1], [0], [0], [0, 0, 1, 0], [], []>} : vector<8x8xf32>, vector<8x8xf32>, vector<8x8xf32> -> vector<8x8xf32>
    %cst_48 = arith.constant -1.000000e+30 : f32
    %150 = vector.broadcast %cst_48 : f32 to vector<8x8xf32>
    %151 = arith.select %12, %150, %149 : vector<8x8xi1>, vector<8x8xf32>
    %cst_49 = arith.constant dense<0xFF800000> : vector<8xf32>
    %152 = vector.multi_reduction <maximumf>, %151, %cst_49 [1] : vector<8x8xf32> to vector<8xf32>
    %153 = vector.shape_cast %152 : vector<8xf32> to vector<8x1xf32>
    %154 = vector.broadcast %153 : vector<8x1xf32> to vector<8x8xf32>
    %155 = arith.subf %151, %154 : vector<8x8xf32>
    %156 = math.exp %155 : vector<8x8xf32>
    %cst_50 = arith.constant dense<0.000000e+00> : vector<8xf32>
    %157 = vector.multi_reduction <add>, %156, %cst_50 [1] : vector<8x8xf32> to vector<8xf32>
    %158 = vector.shape_cast %157 : vector<8xf32> to vector<8x1xf32>
    %cst_51 = arith.constant dense<0.000000e+00> : vector<8x8xf32>
    %159 = tpu.matmul %156, %148, %cst_51 {dimension_numbers = #tpu.dot_dimension_numbers<[1], [0], [0], [1], [0, 0, 1, 1], [], []>} : vector<8x8xf32>, vector<8x8xf32>, vector<8x8xf32> -> vector<8x8xf32>
    %cst_52 = arith.constant 1.000000e+00 : f32
    %160 = vector.broadcast %cst_52 : f32 to vector<8x1xf32>
    %161 = arith.divf %160, %158 : vector<8x1xf32>
    %162 = vector.broadcast %161 : vector<8x1xf32> to vector<8x8xf32>
    %163 = arith.mulf %159, %162 : vector<8x8xf32>
    %164 = tpu.concatenate %109, %127, %145, %163 in 1 : vector<8x8xf32>, vector<8x8xf32>, vector<8x8xf32>, vector<8x8xf32> -> vector<8x32xf32>
    %165 = tpu.concatenate %88, %164 in 0 : vector<8x32xf32>, vector<8x32xf32> -> vector<16x32xf32>
    %c0_53 = arith.constant 0 : index
    %c0_54 = arith.constant 0 : index
    %166 = vector.load %arg3[%c0_53, %c0_54] : memref<32x32xf32, #tpu.memory_space<vmem>>, vector<32x32xf32>
    %cst_55 = arith.constant dense<0.000000e+00> : vector<16x32xf32>
    %167 = tpu.matmul %165, %166, %cst_55 {dimension_numbers = #tpu.dot_dimension_numbers<[1], [0], [0], [1], [0, 0, 1, 1], [], []>} : vector<16x32xf32>, vector<32x32xf32>, vector<16x32xf32> -> vector<16x32xf32>
    %c0_56 = arith.constant 0 : index
    %c0_57 = arith.constant 0 : index
    %168 = vector.load %arg4[%c0_56, %c0_57] : memref<1x32xf32, #tpu.memory_space<vmem>>, vector<1x32xf32>
    %169 = vector.shape_cast %168 : vector<1x32xf32> to vector<32xf32>
    %170 = vector.shape_cast %169 : vector<32xf32> to vector<1x32xf32>
    %171 = vector.broadcast %170 : vector<1x32xf32> to vector<16x32xf32>
    %172 = arith.addf %167, %171 : vector<16x32xf32>
    %c0_58 = arith.constant 0 : index
    %c0_59 = arith.constant 0 : index
    %173 = vector.load %arg5[%c0_58, %c0_59] : memref<16x32xf32, #tpu.memory_space<vmem>>, vector<16x32xf32>
    tpu.vector_store %arg5[%c0_58, %c0_59], %172 {strides = array<i32>} : memref<16x32xf32, #tpu.memory_space<vmem>>, vector<16x32xf32>,
    return
  }
  func.func @transform_0(%arg0: i32) -> (i32, i32) {
    %c0_i32 = arith.constant 0 : i32
    %c0_i32_0 = arith.constant 0 : i32
    %c0_i32_1 = arith.constant 0 : i32
    return %c0_i32, %c0_i32_0 : i32, i32
  }
  func.func @transform_1(%arg0: i32) -> (i32, i32) {
    %c0_i32 = arith.constant 0 : i32
    %c0_i32_0 = arith.constant 0 : i32
    %c0_i32_1 = arith.constant 0 : i32
    return %c0_i32, %c0_i32_0 : i32, i32
  }
  func.func @transform_2(%arg0: i32) -> (i32, i32) {
    %c0_i32 = arith.constant 0 : i32
    %c0_i32_0 = arith.constant 0 : i32
    %c0_i32_1 = arith.constant 0 : i32
    return %c0_i32, %c0_i32_0 : i32, i32
  }
  func.func @transform_3(%arg0: i32) -> (i32, i32) {
    %c0_i32 = arith.constant 0 : i32
    %c0_i32_0 = arith.constant 0 : i32
    %c0_i32_1 = arith.constant 0 : i32
    return %c0_i32, %c0_i32_0 : i32, i32
  }
  func.func @transform_4(%arg0: i32) -> (i32, i32) {
    %c0_i32 = arith.constant 0 : i32
    %c0_i32_0 = arith.constant 0 : i32
    %c0_i32_1 = arith.constant 0 : i32
    return %c0_i32, %c0_i32_0 : i32, i32
  }
}

</mosaic_0001>

<bundles_post_ra>
// kernel: tpu_custom_call.1
= control target key start
LH: loop header
LB: loop body
LE: loop exit
PB: predicated region body
PF: predicated region fallthrough
CT: control target
= control target key end

     0   :  { %9 = vsyncpa [#allocation3], 0  ;;  %s2262_s0 = inlined_call_operand.hbm [shape: f32[16,32], index: 0, kind: input, shape index: {}]   ;;  %s2263_s1 = inlined_call_operand.hbm [shape: f32[32,96], index: 1, kind: input, shape index: {}]   ;;  %s2264_s2 = inlined_call_operand.hbm [shape: f32[32,32], index: 2, kind: input, shape index: {}]   ;;  %s2265_s3 = inlined_call_operand.vmem [shape: f32[1,32], index: 3, kind: input, shape index: {}]   ;;  %s2266_s4 = inlined_call_operand.hbm [shape: f32[16,32], index: 4, kind: output, shape index: {}]  }
   0x1   :  { %10 = vsyncpa [#allocation6], 0 }
   0x2   :  { %11 = vsyncpa [#allocation4], 0  ;;  %s1973_s15 = smov [#allocation5]   ;;  %s1974_s17 = smov [#allocation2]  }
   0x3   :  { %s29_s16 = sshll.u32 %s1973_s15, 4  ;;  %s17_s18 = sshll.u32 %s1974_s17, 4  ;;  %s30_s16 = int_to_ptr.vmem [resolvable:$true] %s29_s16  ;;  %s2019_s18 = int_to_ptr.vmem [resolvable:$true] %s17_s18 }
   0x4   :  { %s1879_s21 = scalar_lea.hbm %s2263_s1, 512 }
   0x5   :  { %p1880_p0 = scmp.ne.s32.totalorder %s2263_s1, %s1879_s21  ;;  %p1883_p1 = scmp.lt.u32.totalorder %s1879_s21, %s2263_s1 }
   0x7   :  { %p1885_p2 = pnand %p1883_p1, %p1880_p0 }
   0x9   :  { %1888 = shalt.err (!%p1885_p2)
}
   0xa   :  { %s1889_s26 = scalar_lea.vmem %s30_s16, 512  ;;  %p1894_p4 = scmp.lt.s32.totalorder %s30_s16, %s30_s16 }
   0xb   :  { %p1890_p3 = scmp.ne.s32.totalorder %s30_s16, %s1889_s26  ;;  %p1895_p5 = scmp.lt.s32.totalorder %s1889_s26, %s1889_s26 }
   0xd   :  { %p1896_p6 = por %p1895_p5, %p1894_p4 }
   0xf   :  { %p1897_p7 = pnand %p1896_p6, %p1890_p3 }
  0x11   :  { %1900 = shalt.err (!%p1897_p7)
}
  0x12   :  { %s1975_s27 = smov 128   ;;  %s1976_s28 = smov 8  }
  0x13   :  { %35 = dma.hbm_to_vmem [thread:$0]  %s2263_s1, 512, %s30_s16, [#allocation6], %s1975_s27, %s1975_s27, %s1976_s28  }
  0x14   :  { %s1901_s7 = scalar_lea.hbm %s2262_s0, 256 }
  0x15   :  { %p1902_p8 = scmp.ne.s32.totalorder %s2262_s0, %s1901_s7  ;;  %p1905_p9 = scmp.lt.u32.totalorder %s1901_s7, %s2262_s0 }
  0x17   :  { %p1907_p10 = pnand %p1905_p9, %p1902_p8 }
  0x19   :  { %1910 = shalt.err (!%p1907_p10)
}
  0x1a   :  { %s1911_s12 = scalar_lea.vmem %s2019_s18, 256  ;;  %p1916_p12 = scmp.lt.s32.totalorder %s2019_s18, %s2019_s18 }
  0x1b   :  { %p1912_p11 = scmp.ne.s32.totalorder %s2019_s18, %s1911_s12  ;;  %p1917_p13 = scmp.lt.s32.totalorder %s1911_s12, %s1911_s12 }
  0x1d   :  { %p1918_p0 = por %p1917_p13, %p1916_p12 }
  0x1f   :  { %p1919_p1 = pnand %p1918_p0, %p1912_p11 }
  0x21   :  { %1922 = shalt.err (!%p1919_p1)
}
  0x22   :  { %23 = dma.hbm_to_vmem [thread:$0]  %s2262_s0, 256, %s2019_s18, [#allocation3], %s1975_s27, %s1975_s27, %s1976_s28  }
  0x23   :  { %s1977_s14 = smov [#allocation7]   ;;  %s1923_s19 = scalar_lea.hbm %s2264_s2, 512 }
  0x24   :  { %s41_s15 = sshll.u32 %s1977_s14, 4  ;;  %p1924_p2 = scmp.ne.s32.totalorder %s2264_s2, %s1923_s19  ;;  %s42_s15 = int_to_ptr.vmem [resolvable:$true] %s41_s15 }
  0x25   :  { %p1927_p3 = scmp.lt.u32.totalorder %s1923_s19, %s2264_s2 }
  0x27   :  { %p1929_p4 = pnand %p1927_p3, %p1924_p2 }
  0x29   :  { %1932 = shalt.err (!%p1929_p4)
}
  0x2a   :  { %s1933_s24 = scalar_lea.vmem %s42_s15, 512  ;;  %p1938_p6 = scmp.lt.s32.totalorder %s42_s15, %s42_s15 }
  0x2b   :  { %p1934_p5 = scmp.ne.s32.totalorder %s42_s15, %s1933_s24  ;;  %p1939_p7 = scmp.lt.s32.totalorder %s1933_s24, %s1933_s24 }
  0x2d   :  { %p1940_p8 = por %p1939_p7, %p1938_p6 }
  0x2f   :  { %p1941_p9 = pnand %p1940_p8, %p1934_p5 }
  0x31   :  { %1944 = shalt.err (!%p1941_p9)
}
  0x32   :  { %47 = dma.hbm_to_vmem [thread:$0]  %s2264_s2, 512, %s42_s15, [#allocation6], %s1975_s27, %s1975_s27, %s1976_s28  }
  0x33   :  { %1967 = dma.done.wait [#allocation3], 256  }
  0x34   :  { %1968 = vsyncadd [#allocation3], 4294967040 }
  0x35   :  { %1969 = dma.done.wait [#allocation6], 1024  }
  0x36   :  { %1970 = vsyncadd [#allocation6], 4294966272  ;;  %vm65_vm0 = vcmask 261120   ;;  %v61_v0 = vld [vmem:[#allocation5] sm:$0xff]  ;;  %v62_v1 = vld [vmem:[#allocation5 + $0x8] sm:$0xff]  ;;  %v1978_v8 = vmov 0.0   ;;  %v149_v23 = vlaneseq }
  0x37   :  { %v63_v2 = vld [vmem:[#allocation5 + $0x10] sm:$0xff]  ;;  %v1810_v3 = vpack.c.bf16 %v62_v1, %v61_v0  ;;  %v64_v4 = vld [vmem:[#allocation5 + $0x18] sm:$0xff]  ;;  %1719 = vmatprep.subr.mxu1 %v1978_v8  ;;  %vm1979_vm1 = vmmov 0   ;;  %s1980_s2 = smov 64   ;;  %s1981_s25 = smov 96   ;;  %vm157_vm2 = vcmask 64512  }
  0x38   :  { %v59_v5 = vld [vmem:[#allocation2] sm:$0xff]  ;;  %v1814_v6 = vpack.c.bf16 %v64_v4, %v63_v2  ;;  %v60_v7 = vld [vmem:[#allocation2 + $0x8] sm:$0xff]  ;;  %1721 = vmatprep.mubr.msk.f32.mxu1 %vm1979_vm1, %v1978_v8  ;;  %s1982_s26 = smov 88   ;;  %s1983_s29 = smov 120   ;;  %v150_v24 = vshrl.u32 %v149_v23, 7  ;;  %v152_v25 = vand.u32 127, %v149_v23 }
  0x39   :  { %1716 = vmatprep.mubr.msk.f32.mxu0 %vm65_vm0, %v59_v5  ;;  %1811 = vmatprep.subr.bf16.mxu0 %v1810_v3  ;;  %s1984_s30 = smov 80   ;;  %s1985_s5 = smov 112   ;;  %vm836_vm4 = vcmask 130048   ;;  %vm838_vm5 = vcmask 195584  }
  0x3a   :  { %1813 = vmatpush3.bf16.msra.mxu0 %v1810_v3  ;;  %s1986_s6 = smov 72   ;;  %s1987_s7 = smov 104   ;;  %vm2125_vm3 = vcmp.gt.s32.totalorder %v152_v25, %v150_v24 }
  0x3b   :  { %1815 = vmatprep.subr.bf16.mxu0 %v1814_v6  ;;  %s1988_s8 = smov 56   ;;  %s1989_s9 = smov 48  }
  0x3c   :  { %s1990_s10 = smov 40   ;;  %s1991_s11 = smov 16  }
  0x3d   :  { %s1992_s12 = smov 24   ;;  %s1993_s14 = smov [#allocation8]  }
  0x3e   :  { %1817 = vmatpush3.bf16.msra.mxu0 %v1814_v6  ;;  %s1622_s15 = sshll.u32 %s1993_s14, 4  ;;  %s1623_s15 = int_to_ptr.vmem [resolvable:$true] %s1622_s15 }
  0x3f   :  { %1739 = vmatprep.subr.mxu0 %v1978_v8  ;;  %s1945_s16 = scalar_lea.vmem %s1623_s15, 256  ;;  %p1950_p11 = scmp.lt.s32.totalorder %s1623_s15, %s1623_s15 }
  0x40   :  { %p1946_p10 = scmp.ne.s32.totalorder %s1623_s15, %s1945_s16  ;;  %p1951_p12 = scmp.lt.s32.totalorder %s1945_s16, %s1945_s16 }
  0x41   :  { %1717 = vmatmul.mubr.msk.f32.vlgmr.msra.gmra.mrb[0].mxu0 %vm65_vm0, %v60_v7 }
  0x42   :  { %1741 = vmatprep.mubr.msk.f32.mxu0 %vm1979_vm1, %v1978_v8  ;;  %p1952_p13 = por %p1951_p12, %p1950_p11 }
  0x44   :  { %p1953_p0 = pnand %p1952_p13, %p1946_p10 }
 0x114   :  { %v2079_v9 = vpop.f32.mrb[0].mxu0 }
 0x115   :  { %v2081_v10 = vpop.f32.mrb[1].mxu0  ;;  %v148_v12 = vmul.f32 0.35355338, %v2079_v9 }
 0x116   :  { %243 = vrot.lane.b32.xlu1 %v2081_v10, %s1980_s2  ;;  %155 = vrot.lane.b32.xlu0 %v2081_v10, %s1981_s25  ;;  %v147_v11 = vmul.f32 0.35355338, %v2081_v10 }
 0x11a   :  { %324 = vrot.lane.b32.xlu1 %v2081_v10, %s1982_s26 }
 0x11e   :  { %322 = vrot.lane.b32.xlu1 %v147_v11, %s1983_s29 }
 0x122   :  { %491 = vrot.lane.b32.xlu1 %v2081_v10, %s1984_s30 }
 0x126   :  { %489 = vrot.lane.b32.xlu1 %v147_v11, %s1985_s5 }
 0x12a   :  { %658 = vrot.lane.b32.xlu1 %v2081_v10, %s1986_s6 }
 0x12e   :  { %656 = vrot.lane.b32.xlu1 %v147_v11, %s1987_s7 }
 0x132   :  { %841 = vrot.lane.b32.xlu1 %v2079_v9, %s1981_s25 }
 0x136   :  { %1009 = vrot.lane.b32.xlu1 %v2079_v9, %s1982_s26 }
 0x13a   :  { %1176 = vrot.lane.b32.xlu1 %v2079_v9, %s1984_s30 }
 0x13e   :  { %1174 = vrot.lane.b32.xlu1 %v148_v12, %s1985_s5 }
 0x142   :  { %1343 = vrot.lane.b32.xlu1 %v2079_v9, %s1986_s6 }
 0x146   :  { %1341 = vrot.lane.b32.xlu1 %v148_v12, %s1987_s7 }
 0x14a   :  { %410 = vrot.lane.b32.xlu1 %v2081_v10, %s1988_s8 }
 0x188   :  { %v244_v13 = vpop.permute.xlu1 %243  ;;  %v156_v14 = vpop.permute.xlu0 %155 }
 0x189   :  { %1720 = vmatpush3.xpose.msk.msra.mxu1 %vm157_vm2, %v156_v14 }
 0x18a   :  { %1724 = vmatprep.subr.mxu1 %v1978_v8 }
 0x18c   :  { %v2100_v15 = vpop.permute.xlu1 %324  ;;  %1722 = vmatmul.mubr.msk.f32.vlgmr.msra.gmra.mrb[0].mxu1 %vm157_vm2, %v147_v11 }
 0x18d   :  { %1725 = vmatpush3.msra.mxu1 %v244_v13  ;;  %1726 = vmatprep.mubr.msk.f32.mxu1 %vm1979_vm1, %v1978_v8 }
 0x18e   :  { %1729 = vmatprep.subr.mxu1 %v1978_v8 }
 0x190   :  { %v2106_v16 = vpop.permute.xlu1 %322 }
 0x194   :  { %v492_v17 = vpop.permute.xlu1 %491 }
 0x195   :  { %1740 = vmatpush3.xpose.msk.msra.mxu0 %vm157_vm2, %v492_v17 }
 0x196   :  { %1749 = vmatprep.subr.mxu0 %v1978_v8 }
 0x198   :  { %v490_v18 = vpop.permute.xlu1 %489 }
 0x199   :  { %1742 = vmatmul.mubr.msk.f32.vlgmr.msra.gmra.mrb[2].mxu0 %vm157_vm2, %v490_v18 }
 0x19a   :  { %1751 = vmatprep.mubr.msk.f32.mxu0 %vm1979_vm1, %v1978_v8 }
 0x19c   :  { %v659_v19 = vpop.permute.xlu1 %658 }
 0x19d   :  { %1750 = vmatpush3.xpose.msk.msra.mxu0 %vm157_vm2, %v659_v19 }
 0x19e   :  { %1759 = vmatprep.subr.mxu0 %v1978_v8 }
 0x1a0   :  { %v657_v20 = vpop.permute.xlu1 %656 }
 0x1a1   :  { %1752 = vmatmul.mubr.msk.f32.vlgmr.msra.gmra.mrb[4].mxu0 %vm157_vm2, %v657_v20 }
 0x1a2   :  { %1761 = vmatprep.mubr.msk.f32.mxu0 %vm1979_vm1, %v1978_v8 }
 0x1a4   :  { %v842_v21 = vpop.permute.xlu1 %841 }
 0x1a5   :  { %1760 = vmatpush3.xpose.msk.msra.mxu0 %vm157_vm2, %v842_v21 }
 0x1a6   :  { %1769 = vmatprep.subr.mxu0 %v1978_v8 }
 0x1a8   :  { %1762 = vmatmul.mubr.msk.f32.vlgmr.msra.gmra.mrb[6].mxu0 %vm157_vm2, %v148_v12  ;;  %v1010_v22 = vpop.permute.xlu1 %1009 }
 0x1a9   :  { %1770 = vmatpush3.xpose.msk.msra.mxu0 %vm157_vm2, %v1010_v22  ;;  %1771 = vmatprep.mubr.msk.f32.mxu0 %vm1979_vm1, %v1978_v8 }
 0x1aa   :  { %1779 = vmatprep.subr.mxu0 %v1978_v8 }
 0x1ac   :  { %v1177_v43 = vpop.permute.xlu1 %1176 }
 0x1b0   :  { %v1175_v44 = vpop.permute.xlu1 %1174 }
 0x1b4   :  { %v1344_v49 = vpop.permute.xlu1 %1343 }
 0x1b8   :  { %v1342_v50 = vpop.permute.xlu1 %1341 }
 0x1bc   :  { %v411_v52 = vpop.permute.xlu1 %410 }
 0x25f   :  { %v229_v27 = vpop.f32.mrb[0].mxu1 }
 0x260   :  { %v233_v28 = vsel %vm2125_vm3, -1e+30, %v229_v27  ;;  %v1723_v29 = vpop.f32.mrb[1].mxu1 }
 0x261   :  { %v234_v30 = vsel %vm157_vm2, %v233_v28, -inf }
 0x262   :  { %235 = vmax.xlane.f32.xlu0 %v234_v30 }
 0x26c   :  { %v563_v31 = vpop.f32.mrb[2].mxu0 }
 0x26d   :  { %v1743_v32 = vpop.f32.mrb[3].mxu0  ;;  %v2141_v39 = vsel %vm2125_vm3, -1e+30, %v563_v31 }
 0x26e   :  { %v568_v40 = vsel %vm157_vm2, %v2141_v39, -inf }
 0x274   :  { %v730_v33 = vpop.f32.mrb[4].mxu0 }
 0x275   :  { %v1753_v34 = vpop.f32.mrb[5].mxu0  ;;  %v2147_v41 = vsel %vm2125_vm3, -1e+30, %v730_v33 }
 0x276   :  { %v735_v42 = vsel %vm157_vm2, %v2147_v41, -inf }
 0x278   :  { %1007 = vrot.lane.b32.xlu0 %v148_v12, %s1983_s29 }
 0x27b   :  { %v914_v35 = vpop.f32.mrb[6].mxu0 }
 0x27c   :  { %v2135_v36 = vsel %vm2125_vm3, -1e+30, %v914_v35  ;;  %v1763_v37 = vpop.f32.mrb[7].mxu0 }
 0x27d   :  { %v919_v38 = vsel %vm157_vm2, %v2135_v36, -inf }
 0x27e   :  { %920 = vmax.xlane.f32.xlu1 %v919_v38 }
 0x297   :  { %569 = vmax.xlane.f32.xlu0 %v568_v40 }
 0x29b   :  { %736 = vmax.xlane.f32.xlu0 %v735_v42 }
 0x2b1   :  { %577 = vrot.lane.b32.xlu0 %v2081_v10, %s1989_s9 }
 0x2ef   :  { %v236_v45 = vpop.xlane.xlu0 %235 }
 0x2f0   :  { %v237_v46 = vsub.f32 %v233_v28, %v236_v45 }
 0x2f2   :  { %v238_v47 = vmul.f32 1.442695, %v237_v46 }
 0x2f3   :  { %v1008_v48 = vpop.permute.xlu0 %1007 }
 0x2f4   :  { %1847 = vpow2.f32 %v238_v47  ;;  %1772 = vmatmul.mubr.msk.f32.vlgmr.msra.gmra.mrb[8].mxu0 %vm157_vm2, %v1008_v48 }
 0x2f5   :  { %1780 = vmatpush3.xpose.msk.msra.mxu0 %vm157_vm2, %v1177_v43  ;;  %1781 = vmatprep.mubr.msk.f32.mxu0 %vm1979_vm1, %v1978_v8 }
 0x2f6   :  { %1789 = vmatprep.subr.mxu0 %v1978_v8 }
 0x2f8   :  { %1782 = vmatmul.mubr.msk.f32.vlgmr.msra.gmra.mrb[10].mxu0 %vm157_vm2, %v1175_v44 }
 0x2f9   :  { %1790 = vmatpush3.xpose.msk.msra.mxu0 %vm157_vm2, %v1344_v49  ;;  %1791 = vmatprep.mubr.msk.f32.mxu0 %vm1979_vm1, %v1978_v8 }
 0x2fc   :  { %1792 = vmatmul.mubr.msk.f32.vlgmr.msra.gmra.mrb[12].mxu0 %vm157_vm2, %v1342_v50 }
 0x2fe   :  { %v2163_v51 = vpop.eup %1847 }
 0x2ff   :  { %1727 = vmatmul.mubr.msk.f32.vlgmr.msra.gmra.mrb[2].mxu1 %vm157_vm2, %v2163_v51  ;;  %v240_v46 = vsel %vm157_vm2, %v2163_v51, 0.0 }
 0x300   :  { %1730 = vmatpush3.xpose.msk.msra.mxu1 %vm157_vm2, %v2100_v15  ;;  %1731 = vmatprep.mubr.msk.f32.mxu1 %vm1979_vm1, %v1978_v8 }
 0x301   :  { %1734 = vmatprep.subr.mxu1 %v1978_v8 }
 0x303   :  { %1732 = vmatmul.mubr.msk.f32.vlgmr.msra.gmra.mrb[4].mxu1 %vm157_vm2, %v2106_v16 }
 0x304   :  { %1735 = vmatpush3.msra.mxu1 %v411_v52  ;;  %1736 = vmatprep.mubr.msk.f32.mxu1 %vm1979_vm1, %v1978_v8 }
 0x305   :  { %1744 = vmatprep.subr.mxu1 %v1978_v8 }
 0x30b   :  { %v921_v21 = vpop.xlane.xlu1 %920 }
 0x324   :  { %v570_v7 = vpop.xlane.xlu0 %569 }
 0x325   :  { %v571_v11 = vsub.f32 %v2141_v39, %v570_v7  ;;  %v1526_v7 = vld [vmem:[#allocation7 + $0x18] sm:$0xff] }
 0x327   :  { %v572_v12 = vmul.f32 1.442695, %v571_v11 }
 0x328   :  { %v737_v15 = vpop.xlane.xlu0 %736 }
 0x329   :  { %1849 = vpow2.f32 %v572_v12 }
 0x32c   :  { %v578_v16 = vpop.permute.xlu0 %577 }
 0x333   :  { %v1850_v13 = vpop.eup %1849 }
 0x334   :  { %v574_v14 = vsel %vm157_vm2, %v1850_v13, 0.0 }
 0x3c7   :  { %v1081_v53 = vpop.f32.mrb[8].mxu0 }
 0x3c8   :  { %v1085_v54 = vsel %vm2125_vm3, -1e+30, %v1081_v53  ;;  %v1773_v55 = vpop.f32.mrb[9].mxu0 }
 0x3c9   :  { %v1086_v56 = vsel %vm157_vm2, %v1085_v54, -inf }
 0x3ca   :  { %1087 = vmax.xlane.f32.xlu0 %v1086_v56 }
 0x3cb   :  { %v1248_v57 = vpop.f32.mrb[10].mxu0 }
 0x3cc   :  { %v1252_v58 = vsel %vm2125_vm3, -1e+30, %v1248_v57  ;;  %v1783_v59 = vpop.f32.mrb[11].mxu0 }
 0x3cd   :  { %v1253_v60 = vsel %vm157_vm2, %v1252_v58, -inf }
 0x3ce   :  { %1254 = vmax.xlane.f32.xlu1 %v1253_v60 }
 0x3cf   :  { %v1415_v61 = vpop.f32.mrb[12].mxu0 }
 0x3d0   :  { %v1419_v62 = vsel %vm2125_vm3, -1e+30, %v1415_v61  ;;  %v1793_v63 = vpop.f32.mrb[13].mxu0 }
 0x3d1   :  { %v1420_v0 = vsel %vm157_vm2, %v1419_v62, -inf }
 0x3d2   :  { %1421 = vmax.xlane.f32.xlu0 %v1420_v0  ;;  %v2186_v1 = vpop.f32.mrb[2].mxu1 }
 0x3d3   :  { %v1728_v2 = vpop.f32.mrb[3].mxu1 }
 0x3d6   :  { %v396_v3 = vpop.f32.mrb[4].mxu1 }
 0x3d7   :  { %v400_v4 = vsel %vm2125_vm3, -1e+30, %v396_v3  ;;  %v1733_v5 = vpop.f32.mrb[5].mxu1 }
 0x3d8   :  { %v401_v6 = vsel %vm157_vm2, %v400_v4, -inf }
 0x3d9   :  { %402 = vmax.xlane.f32.xlu1 %v401_v6  ;;  %v1525_v6 = vld [vmem:[#allocation7 + $0x10] sm:$0xff] }
 0x3da   :  { %v1822_v11 = vpack.c.bf16 %v1526_v7, %v1525_v6 }
 0x3e8   :  { %1262 = vrot.lane.b32.xlu0 %v2079_v9, %s1989_s9 }
 0x3ea   :  { %744 = vrot.lane.b32.xlu1 %v2081_v10, %s1990_s10  ;;  %v738_v10 = vsub.f32 %v2147_v41, %v737_v15 }
 0x3ec   :  { %v739_v19 = vmul.f32 1.442695, %v738_v10 }
 0x3ee   :  { %928 = vrot.lane.b32.xlu1 %v2079_v9, %s1980_s2 }
 0x3f2   :  { %1095 = vrot.lane.b32.xlu1 %v2079_v9, %s1988_s8 }
 0x3f6   :  { %1429 = vrot.lane.b32.xlu1 %v2079_v9, %s1990_s10  ;;  %v922_v9 = vsub.f32 %v2135_v36, %v921_v21 }
 0x3f8   :  { %v923_v24 = vmul.f32 1.442695, %v922_v9 }
 0x41a   :  { %575 = vadd.xlane.f32.xlu1 %v574_v14 }
 0x457   :  { %v1088_v17 = vpop.xlane.xlu0 %1087 }
 0x458   :  { %v1089_v18 = vsub.f32 %v1085_v54, %v1088_v17 }
 0x45a   :  { %v1090_v20 = vmul.f32 1.442695, %v1089_v18 }
 0x45b   :  { %v1255_v25 = vpop.xlane.xlu1 %1254 }
 0x45c   :  { %1851 = vpow2.f32 %v1090_v20  ;;  %v1256_v27 = vsub.f32 %v1252_v58, %v1255_v25 }
 0x45d   :  { %1853 = vpow2.f32 %v739_v19 }
 0x45e   :  { %v1257_v33 = vmul.f32 1.442695, %v1256_v27 }
 0x45f   :  { %v1422_v22 = vpop.xlane.xlu0 %1421 }
 0x460   :  { %v1423_v23 = vsub.f32 %v1419_v62, %v1422_v22  ;;  %v1524_v62 = vld [vmem:[#allocation7 + $0x8] sm:$0xff] }
 0x462   :  { %v1424_v26 = vmul.f32 1.442695, %v1423_v23 }
 0x463   :  { %v1263_v48 = vpop.permute.xlu0 %1262 }
 0x464   :  { %1855 = vpow2.f32 %v1424_v26 }
 0x465   :  { %1857 = vpow2.f32 %v923_v24 }
 0x466   :  { %v1852_v28 = vpop.eup %1851  ;;  %v403_v29 = vpop.xlane.xlu1 %402 }
 0x467   :  { %v404_v30 = vsub.f32 %v400_v4, %v403_v29  ;;  %v1092_v31 = vsel %vm157_vm2, %v1852_v28, 0.0  ;;  %v1854_v32 = vpop.eup %1853 }
 0x468   :  { %1093 = vadd.xlane.f32.xlu0 %v1092_v31  ;;  %v741_v35 = vsel %vm157_vm2, %v1854_v32, 0.0 }
 0x469   :  { %v405_v34 = vmul.f32 1.442695, %v404_v30 }
 0x46a   :  { %v745_v41 = vpop.permute.xlu1 %744 }
 0x46b   :  { %1859 = vpow2.f32 %v405_v34 }
 0x46c   :  { %742 = vadd.xlane.f32.xlu0 %v741_v35  ;;  %1861 = vpow2.f32 %v1257_v33 }
 0x46e   :  { %v1856_v36 = vpop.eup %1855  ;;  %v929_v45 = vpop.permute.xlu1 %928 }
 0x46f   :  { %v1426_v37 = vsel %vm157_vm2, %v1856_v36, 0.0  ;;  %v1858_v38 = vpop.eup %1857 }
 0x470   :  { %1427 = vadd.xlane.f32.xlu1 %v1426_v37  ;;  %v925_v39 = vsel %vm157_vm2, %v1858_v38, 0.0 }
 0x472   :  { %v1096_v47 = vpop.permute.xlu1 %1095 }
 0x474   :  { %926 = vadd.xlane.f32.xlu1 %v925_v39 }
 0x475   :  { %v1860_v40 = vpop.eup %1859 }
 0x476   :  { %1737 = vmatmul.mubr.msk.f32.vlgmr.msra.gmra.mrb[6].mxu1 %vm157_vm2, %v1860_v40  ;;  %v407_v42 = vsel %vm157_vm2, %v1860_v40, 0.0  ;;  %v1862_v43 = vpop.eup %1861  ;;  %v1430_v49 = vpop.permute.xlu1 %1429 }
 0x477   :  { %1745 = vmatpush3.msra.mxu1 %v578_v16  ;;  %408 = vadd.xlane.f32.xlu0 %v407_v42  ;;  %v1259_v44 = vsel %vm157_vm2, %v1862_v43, 0.0 }
 0x478   :  { %1746 = vmatprep.mubr.msk.f32.mxu1 %vm1979_vm1, %v1978_v8  ;;  %1754 = vmatprep.subr.mxu1 %v1978_v8 }
 0x47a   :  { %1747 = vmatmul.mubr.msk.f32.vlgmr.msra.gmra.mrb[8].mxu1 %vm157_vm2, %v1850_v13 }
 0x47b   :  { %1755 = vmatpush3.msra.mxu1 %v745_v41  ;;  %1260 = vadd.xlane.f32.xlu0 %v1259_v44 }
 0x47c   :  { %1756 = vmatprep.mubr.msk.f32.mxu1 %vm1979_vm1, %v1978_v8  ;;  %1764 = vmatprep.subr.mxu1 %v1978_v8 }
 0x47e   :  { %1757 = vmatmul.mubr.msk.f32.vlgmr.msra.gmra.mrb[10].mxu1 %vm157_vm2, %v1854_v32 }
 0x47f   :  { %1765 = vmatpush3.msra.mxu1 %v929_v45  ;;  %241 = vadd.xlane.f32.xlu0 %v240_v46 }
 0x480   :  { %1766 = vmatprep.mubr.msk.f32.mxu1 %vm1979_vm1, %v1978_v8  ;;  %1774 = vmatprep.subr.mxu1 %v1978_v8 }
 0x482   :  { %1767 = vmatmul.mubr.msk.f32.vlgmr.msra.gmra.mrb[12].mxu1 %vm157_vm2, %v1858_v38 }
 0x483   :  { %1775 = vmatpush3.msra.mxu1 %v1096_v47  ;;  %1776 = vmatprep.mubr.msk.f32.mxu1 %vm1979_vm1, %v1978_v8 }
 0x484   :  { %1784 = vmatprep.subr.mxu1 %v1978_v8 }
 0x486   :  { %1777 = vmatmul.mubr.msk.f32.vlgmr.msra.gmra.mrb[14].mxu1 %vm157_vm2, %v1852_v28 }
 0x487   :  { %1785 = vmatpush3.msra.mxu1 %v1263_v48  ;;  %1786 = vmatprep.mubr.msk.f32.mxu1 %vm1979_vm1, %v1978_v8 }
 0x488   :  { %1794 = vmatprep.subr.mxu1 %v1978_v8 }
 0x48a   :  { %1787 = vmatmul.mubr.msk.f32.vlgmr.msra.gmra.mrb[16].mxu1 %vm157_vm2, %v1862_v43 }
 0x48b   :  { %1795 = vmatpush3.msra.mxu1 %v1430_v49  ;;  %1796 = vmatprep.mubr.msk.f32.mxu1 %vm1979_vm1, %v1978_v8  ;;  %v1523_v8 = vld [vmem:[#allocation7] sm:$0xff] }
 0x48c   :  { %v1818_v63 = vpack.c.bf16 %v1524_v62, %v1523_v8 }
 0x48e   :  { %1797 = vmatmul.mubr.msk.f32.vlgmr.msra.gmra.mrb[18].mxu1 %vm157_vm2, %v1856_v36  ;;  %1819 = vmatprep.subr.bf16.mxu0 %v1818_v63 }
 0x48f   :  { %1821 = vmatpush3.bf16.msra.mxu0 %v1818_v63 }
 0x490   :  { %1823 = vmatprep.subr.bf16.mxu0 %v1822_v11 }
 0x493   :  { %1825 = vmatpush3.bf16.msra.mxu0 %v1822_v11 }
 0x4a7   :  { %v576_v53 = vpop.xlane.xlu1 %575 }
 0x4f5   :  { %v1094_v50 = vpop.xlane.xlu0 %1093 }
 0x4f9   :  { %v743_v51 = vpop.xlane.xlu0 %742 }
 0x4fd   :  { %v1428_v12 = vpop.xlane.xlu1 %1427 }
 0x501   :  { %v927_v26 = vpop.xlane.xlu1 %926 }
 0x504   :  { %v409_v52 = vpop.xlane.xlu0 %408 }
 0x505   :  { %1863 = vrcp.f32 %v409_v52 }
 0x506   :  { %1865 = vrcp.f32 %v576_v53 }
 0x507   :  { %1867 = vrcp.f32 %v743_v51 }
 0x508   :  { %1869 = vrcp.f32 %v1094_v50  ;;  %v1261_v0 = vpop.xlane.xlu0 %1260 }
 0x509   :  { %1871 = vrcp.f32 %v1261_v0 }
 0x50a   :  { %1873 = vrcp.f32 %v1428_v12 }
 0x50c   :  { %v242_v25 = vpop.xlane.xlu0 %241 }
 0x50d   :  { %1875 = vrcp.f32 %v242_v25 }
 0x50e   :  { %1877 = vrcp.f32 %v927_v26 }
 0x50f   :  { %v1864_v54 = vpop.eup %1863 }
 0x510   :  { %v1866_v58 = vpop.eup %1865 }
 0x511   :  { %v1868_v2 = vpop.eup %1867 }
 0x512   :  { %v1870_v15 = vpop.eup %1869 }
 0x513   :  { %v1872_v18 = vpop.eup %1871 }
 0x514   :  { %v1874_v9 = vpop.eup %1873 }
 0x517   :  { %v1876_v27 = vpop.eup %1875 }
 0x518   :  { %v321_v30 = vmul.f32 %v1876_v27, %v2186_v1  ;;  %v1878_v35 = vpop.eup %1877  ;;  %v1661_v1 = vld [vmem:[%s2265_s3] ss:$0 sm:$0xff] }
 0x549   :  { %v482_v55 = vpop.f32.mrb[6].mxu1 }
 0x54a   :  { %v488_v56 = vmul.f32 %v1864_v54, %v482_v55  ;;  %v1738_v57 = vpop.f32.mrb[7].mxu1 }
 0x54c   :  { %824 = vrot.lane.b32.xlu0 %v488_v56, %s1976_s28 }
 0x54d   :  { %v649_v59 = vpop.f32.mrb[8].mxu1 }
 0x54e   :  { %v655_v60 = vmul.f32 %v1866_v58, %v649_v59  ;;  %v1748_v61 = vpop.f32.mrb[9].mxu1 }
 0x550   :  { %828 = vrot.lane.b32.xlu1 %v655_v60, %s1991_s11 }
 0x551   :  { %v816_v3 = vpop.f32.mrb[10].mxu1 }
 0x552   :  { %v822_v4 = vmul.f32 %v1868_v2, %v816_v3  ;;  %v1758_v5 = vpop.f32.mrb[11].mxu1 }
 0x554   :  { %832 = vrot.lane.b32.xlu1 %v822_v4, %s1992_s12 }
 0x555   :  { %v1000_v13 = vpop.f32.mrb[12].mxu1 }
 0x556   :  { %v1768_v14 = vpop.f32.mrb[13].mxu1  ;;  %v1006_v37 = vmul.f32 %v1878_v35, %v1000_v13 }
 0x559   :  { %v1167_v16 = vpop.f32.mrb[14].mxu1 }
 0x55a   :  { %v1173_v10 = vmul.f32 %v1870_v15, %v1167_v16  ;;  %v1778_v17 = vpop.f32.mrb[15].mxu1 }
 0x55c   :  { %1509 = vrot.lane.b32.xlu1 %v1173_v10, %s1976_s28 }
 0x55d   :  { %v1334_v19 = vpop.f32.mrb[16].mxu1 }
 0x55e   :  { %v1340_v20 = vmul.f32 %v1872_v18, %v1334_v19  ;;  %v1788_v21 = vpop.f32.mrb[17].mxu1 }
 0x560   :  { %1513 = vrot.lane.b32.xlu0 %v1340_v20, %s1991_s11 }
 0x561   :  { %v1501_v22 = vpop.f32.mrb[18].mxu1 }
 0x562   :  { %v1507_v23 = vmul.f32 %v1874_v9, %v1501_v22  ;;  %v1798_v24 = vpop.f32.mrb[19].mxu1 }
 0x564   :  { %1517 = vrot.lane.b32.xlu1 %v1507_v23, %s1992_s12 }
 0x5be   :  { %v825_v28 = vpop.permute.xlu0 %824 }
 0x5bf   :  { %v835_v31 = vsel %vm157_vm2, %v321_v30, %v825_v28 }
 0x5c2   :  { %v829_v29 = vpop.permute.xlu1 %828 }
 0x5c3   :  { %v837_v32 = vsel %vm836_vm4, %v835_v31, %v829_v29 }
 0x5c6   :  { %v833_v33 = vpop.permute.xlu1 %832 }
 0x5c7   :  { %v839_v34 = vsel %vm838_vm5, %v837_v32, %v833_v33 }
 0x5c8   :  { %1807 = vmatprep.mubr.msk.f32.mxu0 %vm65_vm0, %v839_v34 }
 0x5ce   :  { %v1510_v36 = vpop.permute.xlu1 %1509 }
 0x5cf   :  { %v1520_v39 = vsel %vm157_vm2, %v1006_v37, %v1510_v36 }
 0x5d2   :  { %v1514_v38 = vpop.permute.xlu0 %1513 }
 0x5d3   :  { %v1521_v40 = vsel %vm836_vm4, %v1520_v39, %v1514_v38 }
 0x5d6   :  { %v1518_v41 = vpop.permute.xlu1 %1517 }
 0x5d7   :  { %v1522_v42 = vsel %vm838_vm5, %v1521_v40, %v1518_v41 }
 0x5d8   :  { %1808 = vmatmul.mubr.msk.f32.vlgmr.msra.gmra.mrb[14].mxu0 %vm65_vm0, %v1522_v42 }
 0x6ab   :  { %v1809_v43 = vpop.f32.mrb[14].mxu0 }
 0x6ac   :  { %v1612_v44 = vadd.f32 %v1809_v43, %v1661_v1  ;;  %v1606_v45 = vpop.f32.mrb[15].mxu0 }
 0x6ad   :  { %v1607_v46 = vadd.f32 %v1661_v1, %v1606_v45 }
 0x6ae   :  { %1616 = vst.msk [vmem:[#allocation8 + $0x8] sm:$0xff] %vm65_vm0, %v1612_v44 }
 0x6af   :  { %1615 = vst.msk [vmem:[#allocation8] sm:$0xff] %vm65_vm0, %v1607_v46 }
 0x6b0   :  { %1956 = shalt.err (!%p1953_p0)
}
 0x6b1   :  { %s1957_s19 = scalar_lea.hbm %s2266_s4, 256 }
 0x6b2   :  { %p1958_p1 = scmp.ne.s32.totalorder %s2266_s4, %s1957_s19  ;;  %p1961_p2 = scmp.lt.u32.totalorder %s1957_s19, %s2266_s4 }
 0x6b4   :  { %p1963_p3 = pnand %p1961_p2, %p1958_p1 }
 0x6b6   :  { %1966 = shalt.err (!%p1963_p3)
}
 0x6b7   :  { %1628 = dma.vmem_to_hbm [thread:$0]  %s1623_s15, 256, %s2266_s4, [#allocation4], %s1975_s27, %s1975_s27, %s1976_s28  }
 0x6b8   :  { %1971 = dma.done.wait [#allocation4], 256  }
 0x6b9   :  { %1972 = vsyncadd [#allocation4], 4294967040 }
 0x6ba   :  { %1632 = vsyncpa [#allocation3], 1 }
 0x6bb   :  { %1633 = vsyncpa [#allocation6], 1 }
 0x6bc   :  { %1634 = vsyncpa [#allocation4], 1 }

</bundles_post_ra>
